<compile_context>
chip_gen: v7x
topology: tpu7x:2x2x1
jax: 0.10.0
libtpu: 0.0.40
codegen_flags: <defaults>
</compile_context>

<pallas_src>
import math

import jax
import jax.numpy as jnp
from jax.experimental import pallas as pl
from jax.experimental.pallas import tpu as pltpu


MIN_KERNEL_BYTES = 1 << 20        # below 1 MiB, kernel launch overhead dominates -> identity
TARGET_STEP_BYTES = 8 << 20       # ~8 MiB of payload per grid step
MAX_INFLIGHT = 4                  # outstanding DMAs per grid step
LANE_CAP = 8192                   # lane-dense last dim (multiple of 128)


def _cdiv(a: int, b: int) -> int:
    return -(-a // b)


def _round_up(a: int, b: int) -> int:
    return _cdiv(a, b) * b


def _pick_cols(n: int):
    """Largest multiple of 128 that divides n, capped at LANE_CAP (None if n % 128 != 0)."""
    for k in range(LANE_CAP // 128, 0, -1):
        c = 128 * k
        if n % c == 0:
            return c
    return None


def _copy_slab_hbm(slab: jax.Array) -> jax.Array:
    """HBM->HBM DMA copy of a lane-dense (rows, cols) slab, cols % 128 == 0."""
    rows, cols = slab.shape
    itemsize = jnp.dtype(slab.dtype).itemsize
    total_bytes = rows * cols * itemsize
    # Sublane packing granularity: 8 rows (4-byte), 16 (2-byte), 32 (1-byte).
    sub = {4: 8, 2: 16, 1: 32}.get(itemsize, 8)

    # Grid sizing: >= 2 steps always (>= 4 for slabs >= 4 MiB) so v7x's two
    # TensorCores both drive DMA; each step targets ~8 MiB of payload.
    min_steps = 4 if total_bytes >= (4 << 20) else 2
    g_target = max(min_steps, _cdiv(total_bytes, TARGET_STEP_BYTES))
    step_rows = max(sub, _round_up(_cdiv(rows, g_target), sub))
    step_rows = min(step_rows, rows)
    g_full, tail_rows = divmod(rows, step_rows)
    num_steps = g_full + (1 if tail_rows else 0)

    # Within a step: up to MAX_INFLIGHT outstanding DMA chunks (static layout).
    nbuf = max(1, min(MAX_INFLIGHT, step_rows // sub))
    chunk_rows = _round_up(_cdiv(step_rows, nbuf), sub)

    def _chunks(nrows: int):
        out, off = [], 0
        while off < nrows:
            sz = min(chunk_rows, nrows - off)
            out.append((off, sz))
            off += sz
        return out

    full_chunks = _chunks(step_rows)
    tail_chunks = _chunks(tail_rows) if tail_rows else []
    nsem = max(len(full_chunks), len(tail_chunks), 1)

    def kernel(x_hbm, o_hbm, sem):
        i = pl.program_id(0)
        base = i * step_rows

        def copy_range(chunks, base_off):
            # Issue all chunk DMAs (multiple outstanding), then wait in order.
            descs = []
            for slot, (off, nrows) in enumerate(chunks):
                r0 = base_off + off
                descs.append(
                    pltpu.make_async_copy(
                        x_hbm.at[pl.ds(r0, nrows), :],
                        o_hbm.at[pl.ds(r0, nrows), :],
                        sem.at[slot],
                    )
                )
            for d in descs:
                d.start()
            for d in descs:
                d.wait()

        if tail_rows:
            @pl.when(i < g_full)
            def _():
                copy_range(full_chunks, base)

            @pl.when(i == g_full)
            def _():
                copy_range(tail_chunks, g_full * step_rows)
        else:
            copy_range(full_chunks, base)

    return pl.pallas_call(
        kernel,
        out_shape=jax.ShapeDtypeStruct((rows, cols), slab.dtype),
        grid_spec=pltpu.PrefetchScalarGridSpec(
            num_scalar_prefetch=0,
            grid=(num_steps,),
            in_specs=[pl.BlockSpec(memory_space=pl.ANY)],   # raw HBM ref, no auto-DMA
            out_specs=pl.BlockSpec(memory_space=pl.ANY),    # raw HBM ref, we DMA into it
            scratch_shapes=[pltpu.SemaphoreType.DMA((nsem,))],
        ),
        compiler_params=pltpu.CompilerParams(
            dimension_semantics=("parallel",),
        ),
        cost_estimate=pl.CostEstimate(
            flops=0,
            transcendentals=0,
            bytes_accessed=2 * total_bytes,
        ),
    )(slab)


def _hook_point_pallas(x: jax.Array) -> jax.Array:
    orig_shape = x.shape
    n = math.prod(orig_shape) if orig_shape else 1
    itemsize = jnp.dtype(x.dtype).itemsize

    # Fast path: the module's forward is the identity, so for small activations
    # (kernel launch overhead dominates) and lane-ragged sizes (numel % 128 != 0,
    # would need a wrapper-side pad copy) just return x: zero HBM traffic and
    # XLA can elide/fuse it.
    if n == 0 or (n * itemsize) < MIN_KERNEL_BYTES or (n % 128) != 0:
        return x

    cols = _pick_cols(n)           # guaranteed not None since n % 128 == 0
    slab = x.reshape(n // cols, cols)
    return _copy_slab_hbm(slab).reshape(orig_shape)


# pallas_call has no automatic autodiff; the forward is the identity, so the
# VJP is the identity as well.
@jax.custom_vjp
def hook_point_forward(x):
    """Identity forward pass of HookPoint, executed through the Pallas DMA-copy kernel."""
    return _hook_point_pallas(x)


def _hp_fwd(x):
    return _hook_point_pallas(x), None


def _hp_bwd(_, g):
    return (g,)


hook_point_forward.defvjp(_hp_fwd, _hp_bwd)


class HookPoint:
    """JAX-side mirror of the PyTorch HookPoint module.

    forward(x) == x, executed through the Pallas HBM->HBM copy kernel for
    large, lane-aligned activations.  Hook registration is kept as plain
    Python callbacks applied to the output.
    """

    def __init__(self):
        # HookPoint has no parameters — nothing to initialize.
        self.fwd_hooks = []
        self.bwd_hooks = []
        self.name = None

    def give_name(self, name):
        self.name = name

    def add_hook(self, hook, dir="fwd"):
        if dir == "fwd":
            self.fwd_hooks.append(hook)
        elif dir == "bwd":
            # TODO(synk): backward hooks would need to be wired into the custom_vjp
            # bwd rule; forward semantics (identity) are fully implemented.
            self.bwd_hooks.append(hook)
        else:
            raise ValueError(f"Invalid direction {dir}")

    def remove_hooks(self, dir="fwd"):
        if dir in ("fwd", "both"):
            self.fwd_hooks = []
        if dir in ("bwd", "both"):
            self.bwd_hooks = []
        if dir not in ("fwd", "bwd", "both"):
            raise ValueError(f"Invalid direction {dir}")

    def forward(self, x):
        out = hook_point_forward(x)
        for hook in self.fwd_hooks:
            res = hook(out, name=self.name)
            if res is not None:
                out = res
        return out

    __call__ = forward


if __name__ == "__main__":
    hp = HookPoint()
    hp.give_name("blocks.0.hook_resid_pre")

    # Spec-scale NCHW activation (2,4,16,16): small -> identity fast path.
    x_small = jax.random.normal(jax.random.PRNGKey(0), (2, 4, 16, 16), dtype=jnp.float32)
    y_small = jax.block_until_ready(hp(x_small))
    assert y_small.shape == x_small.shape and y_small.dtype == x_small.dtype
    assert bool(jnp.all(y_small == x_small))

    # Activation large enough for the Pallas HBM->HBM DMA path
    # (batch=2, seq=512, hidden=1024, f32 = 4 MiB -> 4 parallel grid steps,
    #  4 outstanding 256 KiB DMAs per step).
    x_big = jax.random.normal(jax.random.PRNGKey(1), (2, 512, 1024), dtype=jnp.float32)
    y_big = jax.block_until_ready(hp(x_big))
    assert y_big.shape == x_big.shape and y_big.dtype == x_big.dtype
    assert bool(jnp.all(y_big == x_big))

    # Same kernel path under jit with a packed dtype (bf16, 2 MiB).
    x_bf16 = jax.random.normal(jax.random.PRNGKey(2), (2, 512, 1024), dtype=jnp.bfloat16)
    y_bf16 = jax.block_until_ready(jax.jit(hook_point_forward)(x_bf16))
    assert y_bf16.shape == x_bf16.shape and y_bf16.dtype == x_bf16.dtype
    assert bool(jnp.all(y_bf16 == x_bf16))

    # Lane-ragged shape (numel % 128 != 0) -> identity fast path.
    x_rag = jax.random.normal(jax.random.PRNGKey(3), (3, 5, 7), dtype=jnp.float32)
    y_rag = jax.block_until_ready(hp(x_rag))
    assert bool(jnp.all(y_rag == x_rag))

    # Gradient flows through the identity custom_vjp (kernel path).
    g = jax.block_until_ready(jax.grad(lambda a: jnp.sum(hook_point_forward(a)))(x_big))
    assert bool(jnp.all(g == jnp.ones_like(x_big)))

    print("KERNEL_OK")
</pallas_src>

<mosaic_0001>
module attributes {stable_mosaic.version = 11 : i64} {
  func.func @kernel(%arg0: i32, %arg1: memref<128x8192xf32, #tpu.memory_space<any>>, %arg2: memref<128x8192xf32, #tpu.memory_space<any>>, %arg3: memref<4x!tpu.dma_semaphore, #tpu.memory_space<semaphore_mem>>) attributes {dimension_semantics = [#tpu.dimension_semantics<parallel>], iteration_bounds = array<i64: 4>, scalar_prefetch = 0 : i64, scratch_operands = 1 : i64, tpu.core_type = #tpu.core_type<tc>, window_params = [{}, {}]} {
    %c32_i32 = arith.constant 32 : i32
    %0 = arith.muli %arg0, %c32_i32 : i32
    %c0_i32 = arith.constant 0 : i32
    %1 = arith.addi %0, %c0_i32 : i32
    %c8_i32 = arith.constant 8 : i32
    %2 = arith.addi %0, %c8_i32 : i32
    %c16_i32 = arith.constant 16 : i32
    %3 = arith.addi %0, %c16_i32 : i32
    %c24_i32 = arith.constant 24 : i32
    %4 = arith.addi %0, %c24_i32 : i32
    %c0_i32_0 = arith.constant 0 : i32
    %c0_i32_1 = arith.constant 0 : i32
    %5 = tpu.memref_slice %arg1[%1, %c0_i32_1] : memref<128x8192xf32, #tpu.memory_space<any>> -> memref<8x8192xf32, #tpu.memory_space<any>>
    %c0_i32_2 = arith.constant 0 : i32
    %6 = tpu.memref_slice %arg2[%1, %c0_i32_2] : memref<128x8192xf32, #tpu.memory_space<any>> -> memref<8x8192xf32, #tpu.memory_space<any>>
    %7 = tpu.memref_slice %arg3[%c0_i32_0] : memref<4x!tpu.dma_semaphore, #tpu.memory_space<semaphore_mem>> -> memref<1x!tpu.dma_semaphore, #tpu.memory_space<semaphore_mem>>
    %8 = tpu.memref_squeeze %7 : memref<1x!tpu.dma_semaphore, #tpu.memory_space<semaphore_mem>> -> memref<!tpu.dma_semaphore, #tpu.memory_space<semaphore_mem>>
    tpu.enqueue_dma source(%5 : memref<8x8192xf32, #tpu.memory_space<any>>) target(%6 : memref<8x8192xf32, #tpu.memory_space<any>>) target_semaphore(%8 : memref<!tpu.dma_semaphore, #tpu.memory_space<semaphore_mem>>)
    %c1_i32 = arith.constant 1 : i32
    %c0_i32_3 = arith.constant 0 : i32
    %9 = tpu.memref_slice %arg1[%2, %c0_i32_3] : memref<128x8192xf32, #tpu.memory_space<any>> -> memref<8x8192xf32, #tpu.memory_space<any>>
    %c0_i32_4 = arith.constant 0 : i32
    %10 = tpu.memref_slice %arg2[%2, %c0_i32_4] : memref<128x8192xf32, #tpu.memory_space<any>> -> memref<8x8192xf32, #tpu.memory_space<any>>
    %11 = tpu.memref_slice %arg3[%c1_i32] : memref<4x!tpu.dma_semaphore, #tpu.memory_space<semaphore_mem>> -> memref<1x!tpu.dma_semaphore, #tpu.memory_space<semaphore_mem>>
    %12 = tpu.memref_squeeze %11 : memref<1x!tpu.dma_semaphore, #tpu.memory_space<semaphore_mem>> -> memref<!tpu.dma_semaphore, #tpu.memory_space<semaphore_mem>>
    tpu.enqueue_dma source(%9 : memref<8x8192xf32, #tpu.memory_space<any>>) target(%10 : memref<8x8192xf32, #tpu.memory_space<any>>) target_semaphore(%12 : memref<!tpu.dma_semaphore, #tpu.memory_space<semaphore_mem>>)
    %c2_i32 = arith.constant 2 : i32
    %c0_i32_5 = arith.constant 0 : i32
    %13 = tpu.memref_slice %arg1[%3, %c0_i32_5] : memref<128x8192xf32, #tpu.memory_space<any>> -> memref<8x8192xf32, #tpu.memory_space<any>>
    %c0_i32_6 = arith.constant 0 : i32
    %14 = tpu.memref_slice %arg2[%3, %c0_i32_6] : memref<128x8192xf32, #tpu.memory_space<any>> -> memref<8x8192xf32, #tpu.memory_space<any>>
    %15 = tpu.memref_slice %arg3[%c2_i32] : memref<4x!tpu.dma_semaphore, #tpu.memory_space<semaphore_mem>> -> memref<1x!tpu.dma_semaphore, #tpu.memory_space<semaphore_mem>>
    %16 = tpu.memref_squeeze %15 : memref<1x!tpu.dma_semaphore, #tpu.memory_space<semaphore_mem>> -> memref<!tpu.dma_semaphore, #tpu.memory_space<semaphore_mem>>
    tpu.enqueue_dma source(%13 : memref<8x8192xf32, #tpu.memory_space<any>>) target(%14 : memref<8x8192xf32, #tpu.memory_space<any>>) target_semaphore(%16 : memref<!tpu.dma_semaphore, #tpu.memory_space<semaphore_mem>>)
    %c3_i32 = arith.constant 3 : i32
    %c0_i32_7 = arith.constant 0 : i32
    %17 = tpu.memref_slice %arg1[%4, %c0_i32_7] : memref<128x8192xf32, #tpu.memory_space<any>> -> memref<8x8192xf32, #tpu.memory_space<any>>
    %c0_i32_8 = arith.constant 0 : i32
    %18 = tpu.memref_slice %arg2[%4, %c0_i32_8] : memref<128x8192xf32, #tpu.memory_space<any>> -> memref<8x8192xf32, #tpu.memory_space<any>>
    %19 = tpu.memref_slice %arg3[%c3_i32] : memref<4x!tpu.dma_semaphore, #tpu.memory_space<semaphore_mem>> -> memref<1x!tpu.dma_semaphore, #tpu.memory_space<semaphore_mem>>
    %20 = tpu.memref_squeeze %19 : memref<1x!tpu.dma_semaphore, #tpu.memory_space<semaphore_mem>> -> memref<!tpu.dma_semaphore, #tpu.memory_space<semaphore_mem>>
    tpu.enqueue_dma source(%17 : memref<8x8192xf32, #tpu.memory_space<any>>) target(%18 : memref<8x8192xf32, #tpu.memory_space<any>>) target_semaphore(%20 : memref<!tpu.dma_semaphore, #tpu.memory_space<semaphore_mem>>)
    %c0_i32_9 = arith.constant 0 : i32
    %c0_i32_10 = arith.constant 0 : i32
    %21 = tpu.memref_slice %arg1[%1, %c0_i32_10] : memref<128x8192xf32, #tpu.memory_space<any>> -> memref<8x8192xf32, #tpu.memory_space<any>>
    %c0_i32_11 = arith.constant 0 : i32
    %22 = tpu.memref_slice %arg2[%1, %c0_i32_11] : memref<128x8192xf32, #tpu.memory_space<any>> -> memref<8x8192xf32, #tpu.memory_space<any>>
    %23 = tpu.memref_slice %arg3[%c0_i32_9] : memref<4x!tpu.dma_semaphore, #tpu.memory_space<semaphore_mem>> -> memref<1x!tpu.dma_semaphore, #tpu.memory_space<semaphore_mem>>
    %24 = tpu.memref_squeeze %23 : memref<1x!tpu.dma_semaphore, #tpu.memory_space<semaphore_mem>> -> memref<!tpu.dma_semaphore, #tpu.memory_space<semaphore_mem>>
    tpu.wait_dma2 semaphore(%24 : memref<!tpu.dma_semaphore, #tpu.memory_space<semaphore_mem>>) src(%21 : memref<8x8192xf32, #tpu.memory_space<any>>) dst(%22 : memref<8x8192xf32, #tpu.memory_space<any>>)
    %c1_i32_12 = arith.constant 1 : i32
    %c0_i32_13 = arith.constant 0 : i32
    %25 = tpu.memref_slice %arg1[%2, %c0_i32_13] : memref<128x8192xf32, #tpu.memory_space<any>> -> memref<8x8192xf32, #tpu.memory_space<any>>
    %c0_i32_14 = arith.constant 0 : i32
    %26 = tpu.memref_slice %arg2[%2, %c0_i32_14] : memref<128x8192xf32, #tpu.memory_space<any>> -> memref<8x8192xf32, #tpu.memory_space<any>>
    %27 = tpu.memref_slice %arg3[%c1_i32_12] : memref<4x!tpu.dma_semaphore, #tpu.memory_space<semaphore_mem>> -> memref<1x!tpu.dma_semaphore, #tpu.memory_space<semaphore_mem>>
    %28 = tpu.memref_squeeze %27 : memref<1x!tpu.dma_semaphore, #tpu.memory_space<semaphore_mem>> -> memref<!tpu.dma_semaphore, #tpu.memory_space<semaphore_mem>>
    tpu.wait_dma2 semaphore(%28 : memref<!tpu.dma_semaphore, #tpu.memory_space<semaphore_mem>>) src(%25 : memref<8x8192xf32, #tpu.memory_space<any>>) dst(%26 : memref<8x8192xf32, #tpu.memory_space<any>>)
    %c2_i32_15 = arith.constant 2 : i32
    %c0_i32_16 = arith.constant 0 : i32
    %29 = tpu.memref_slice %arg1[%3, %c0_i32_16] : memref<128x8192xf32, #tpu.memory_space<any>> -> memref<8x8192xf32, #tpu.memory_space<any>>
    %c0_i32_17 = arith.constant 0 : i32
    %30 = tpu.memref_slice %arg2[%3, %c0_i32_17] : memref<128x8192xf32, #tpu.memory_space<any>> -> memref<8x8192xf32, #tpu.memory_space<any>>
    %31 = tpu.memref_slice %arg3[%c2_i32_15] : memref<4x!tpu.dma_semaphore, #tpu.memory_space<semaphore_mem>> -> memref<1x!tpu.dma_semaphore, #tpu.memory_space<semaphore_mem>>
    %32 = tpu.memref_squeeze %31 : memref<1x!tpu.dma_semaphore, #tpu.memory_space<semaphore_mem>> -> memref<!tpu.dma_semaphore, #tpu.memory_space<semaphore_mem>>
    tpu.wait_dma2 semaphore(%32 : memref<!tpu.dma_semaphore, #tpu.memory_space<semaphore_mem>>) src(%29 : memref<8x8192xf32, #tpu.memory_space<any>>) dst(%30 : memref<8x8192xf32, #tpu.memory_space<any>>)
    %c3_i32_18 = arith.constant 3 : i32
    %c0_i32_19 = arith.constant 0 : i32
    %33 = tpu.memref_slice %arg1[%4, %c0_i32_19] : memref<128x8192xf32, #tpu.memory_space<any>> -> memref<8x8192xf32, #tpu.memory_space<any>>
    %c0_i32_20 = arith.constant 0 : i32
    %34 = tpu.memref_slice %arg2[%4, %c0_i32_20] : memref<128x8192xf32, #tpu.memory_space<any>> -> memref<8x8192xf32, #tpu.memory_space<any>>
    %35 = tpu.memref_slice %arg3[%c3_i32_18] : memref<4x!tpu.dma_semaphore, #tpu.memory_space<semaphore_mem>> -> memref<1x!tpu.dma_semaphore, #tpu.memory_space<semaphore_mem>>
    %36 = tpu.memref_squeeze %35 : memref<1x!tpu.dma_semaphore, #tpu.memory_space<semaphore_mem>> -> memref<!tpu.dma_semaphore, #tpu.memory_space<semaphore_mem>>
    tpu.wait_dma2 semaphore(%36 : memref<!tpu.dma_semaphore, #tpu.memory_space<semaphore_mem>>) src(%33 : memref<8x8192xf32, #tpu.memory_space<any>>) dst(%34 : memref<8x8192xf32, #tpu.memory_space<any>>)
    return
  }
}

</mosaic_0001>

<bundles_post_ra>
// kernel: tpu_custom_call.1
= control target key start
LH: loop header
LB: loop body
LE: loop exit
PB: predicated region body
PF: predicated region fallthrough
CT: control target
= control target key end

     0   :  { %s235_s6 = smov 0   ;;  %s268_s0 = inlined_call_operand.hbm [shape: f32[128,8192], index: 0, kind: input, shape index: {}]   ;;  %s269_s1 = inlined_call_operand.hbm [shape: f32[128,8192], index: 1, kind: output, shape index: {}]  }
   0x1 LB: > { %s158_s7 = sshll.u32 %s214_s6, 5  ;;  %s216_s18 = smov [#allocation2]   ;;  %s214_s6 = sphi %s235_s6, %s11_s6  }
   0x2   : > { %s17_s8 = sshra.s32 %s158_s7, 3  ;;  %s14_s9 = sadd.s32 8, %s158_s7 }
   0x3   : > { %s175_s10 = sshll.u32 %s17_s8, 13  ;;  %s37_s11 = sshra.s32 %s14_s9, 3 }
   0x4   : > { %s21_s14 = scalar_lea.hbm %s268_s0, %s175_s10  ;;  %s23_s17 = scalar_lea.hbm %s269_s1, %s175_s10 }
   0x5   : > { %s217_s19 = smov [#allocation3]   ;;  %s218_s20 = smov 0  }
   0x6   : > { %36 = dma.general %s21_s14, 8192, %s23_s17, %s216_s18, %s217_s19, [#allocation4], %s218_s20, 0  }
   0x7   : > { %s177_s21 = sshll.u32 %s37_s11, 13  ;;  %s15_s28 = sadd.s32 16, %s158_s7 }
   0x8   : > { %s41_s24 = scalar_lea.hbm %s268_s0, %s177_s21  ;;  %s43_s27 = scalar_lea.hbm %s269_s1, %s177_s21 }
   0x9   : > { %s219_s29 = smov [#allocation2 + $0x1]   ;;  %s220_s30 = smov [#allocation5]  }
   0xa   : > { %57 = dma.general %s41_s24, 8192, %s43_s27, %s219_s29, %s220_s30, [#allocation6], %s218_s20, 0  }
   0xb   : > { %s58_s2 = sshra.s32 %s15_s28, 3  ;;  %s221_s12 = smov [#allocation2 + $0x2]  }
   0xc   : > { %s179_s3 = sshll.u32 %s58_s2, 13  ;;  %s222_s13 = smov [#allocation7]  }
   0xd   : > { %s62_s8 = scalar_lea.hbm %s268_s0, %s179_s3  ;;  %s64_s11 = scalar_lea.hbm %s269_s1, %s179_s3 }
   0xe   : > { %78 = dma.general %s62_s8, 8192, %s64_s11, %s221_s12, %s222_s13, [#allocation8], %s218_s20, 0  }
   0xf   : > { %s16_s14 = sadd.s32 24, %s158_s7  ;;  %s223_s24 = smov [#allocation2 + $0x3]  }
  0x10   : > { %s79_s15 = sshra.s32 %s16_s14, 3  ;;  %s224_s25 = smov [#allocation9]  }
  0x11   : > { %s181_s16 = sshll.u32 %s79_s15, 13 }
  0x12   : > { %s83_s19 = scalar_lea.hbm %s268_s0, %s181_s16  ;;  %s85_s23 = scalar_lea.hbm %s269_s1, %s181_s16 }
  0x13   : > { %99 = dma.general %s83_s19, 8192, %s85_s23, %s223_s24, %s224_s25, [#allocation10], %s218_s20, 0  }
  0x14   : > { %204 = dma.done.wait [#allocation2], 8192 }
  0x15   : > { %205 = vsyncadd [#allocation2], 4294959104 }
  0x16   : > { %206 = dma.done.wait [#allocation2 + $0x1], 8192 }
  0x17   : > { %207 = vsyncadd [#allocation2 + $0x1], 4294959104 }
  0x18   : > { %208 = dma.done.wait [#allocation2 + $0x2], 8192 }
  0x19   : > { %209 = vsyncadd [#allocation2 + $0x2], 4294959104 }
  0x1a   : > { %210 = dma.done.wait [#allocation2 + $0x3], 8192 }
  0x1b   : > { %211 = vsyncadd [#allocation2 + $0x3], 4294959104  ;;  %s11_s6 = sadd.s32 1, %s214_s6  }
  0x1c   : > { %p8_p0 = scmp.ge.s32.totalorder %s11_s6, 4  }
  0x1e   :  { %10 = sbr.rel (!%p8_p0) target bundleno = 1 (0x1), region = 33 }
  0x25   :  { %110 = vsyncmov [#allocation2] }
  0x28   :  { %s111_s7 = vpop.sfrf %110 }
  0x29   :  { %p171_p1 = scmp.ne.s32.totalorder %s111_s7, 0 }
  0x2b   :  { %115 = shalt.err (%p171_p1)  }
  0x2c   :  { %117 = vsyncmov [#allocation2 + $0x1] }
  0x2f   :  { %s118_s20 = vpop.sfrf %117 }
  0x30   :  { %p172_p2 = scmp.ne.s32.totalorder %s118_s20, 0 }
  0x32   :  { %122 = shalt.err (%p172_p2)  }
  0x33   :  { %124 = vsyncmov [#allocation2 + $0x2] }
  0x36   :  { %s125_s26 = vpop.sfrf %124 }
  0x37   :  { %p173_p3 = scmp.ne.s32.totalorder %s125_s26, 0 }
  0x39   :  { %129 = shalt.err (%p173_p3)  }
  0x3a   :  { %131 = vsyncmov [#allocation2 + $0x3] }
  0x3d   :  { %s132_s27 = vpop.sfrf %131 }
  0x3e   :  { %p174_p4 = scmp.ne.s32.totalorder %s132_s27, 0 }
  0x40   :  { %136 = shalt.err (%p174_p4)  }

</bundles_post_ra>
